<compile_context>
chip_gen: v6e
topology: v6e:2x2x1
jax: 0.10.0
libtpu: 0.0.40
codegen_flags: <defaults>
</compile_context>

<pallas_src>
import functools

import jax
import jax.numpy as jnp
from jax import lax
from jax.experimental import pallas as pl
from jax.experimental.pallas import tpu as pltpu


# ----------------------------- kernel -------------------------------------- #

def bert_output_kernel(x_ref, res_ref, w_ref, b_ref, g_ref, beta_ref, o_ref,
                       *, eps, inv_h):
    # x_ref    : (bm, I)  intermediate activations tile (f32 or bf16)
    # res_ref  : (bm, H)  residual (input_tensor) tile
    # w_ref    : (I, H)   bf16 dense weight, resident & single-buffered
    # b_ref    : (1, H)   dense bias
    # g_ref    : (1, H)   LayerNorm weight (gamma)
    # beta_ref : (1, H)   LayerNorm bias  (beta)
    # o_ref    : (bm, H)  output tile (H on the lane axis)
    x = x_ref[...].astype(jnp.bfloat16)                      # feed the MXU in bf16

    # dense: x @ W (MXU, f32 accumulation) + bias + residual, all in VMEM.
    h = jnp.dot(x, w_ref[...], preferred_element_type=jnp.float32)
    h = h + b_ref[...].astype(jnp.float32) + res_ref[...].astype(jnp.float32)

    # TODO(synk): hidden_dropout_prob dropout is identity in eval mode (no-op).

    # LayerNorm over the hidden (lane) dim, biased variance, eps inside rsqrt
    # (matches torch.nn.LayerNorm). One-pass moments, no divides.
    mean = jnp.sum(h, axis=-1, keepdims=True) * inv_h
    ex2 = jnp.sum(h * h, axis=-1, keepdims=True) * inv_h
    var = jnp.maximum(ex2 - mean * mean, 0.0)
    inv = lax.rsqrt(var + eps)                               # EUP slot
    o_ref[...] = ((h - mean) * inv * g_ref[...].astype(jnp.float32)
                  + beta_ref[...].astype(jnp.float32)).astype(o_ref.dtype)


# ----------------------------- wrapper ------------------------------------- #

def _pick_block_m(M, target):
    """Full M if it fits; else the largest multiple-of-8 divisor of M <= target."""
    target = max(8, int(target))
    if M <= target:
        return M
    d = (target // 8) * 8
    while d >= 8:
        if M % d == 0:
            return d
        d -= 8
    # TODO(synk): M has no multiple-of-8 divisor <= target (e.g. odd M); fall
    # back to a single full tile rather than adding a cdiv+mask path.
    return M


def bert_output(hidden_states, input_tensor, params, *, eps=1e-12,
                block_m=None, alias_residual=False):
    """Pallas implementation of BertOutput.forward (eval mode).

    hidden_states : (B, S, I)  output of BertIntermediate (f32 or bf16)
    input_tensor  : (B, S, H)  residual input
    params        : dict with
                      w     : (I, H)  dense weight (transposed vs nn.Linear)
                      b     : (H,)    dense bias
                      gamma : (H,)    LayerNorm weight
                      beta  : (H,)    LayerNorm bias
    Returns (B, S, H) in input_tensor's dtype.
    """
    B, S, I = hidden_states.shape
    H = input_tensor.shape[-1]
    M = B * S
    out_dtype = input_tensor.dtype

    # Fold (B, S) -> M: fewer, larger grid steps; one parallel axis for megacore.
    x2 = hidden_states.reshape(M, I)
    r2 = input_tensor.reshape(M, H)

    # Weight goes to the MXU in bf16 (f32 accumulation in-kernel): ~2-3x matmul
    # throughput and half the resident VMEM / HBM bytes for W.
    w = params["w"].astype(jnp.bfloat16)
    b = params["b"].reshape(1, H)
    gamma = params["gamma"].reshape(1, H)
    beta = params["beta"].reshape(1, H)

    # -------- generation-aware tile sizing & VMEM budget -------------------- #
    try:
        vmem_cap = int(pltpu.get_tpu_info().vmem_capacity_bytes)
    except Exception:
        vmem_cap = 64 * 1024 * 1024            # conservative (v7x per-TensorCore)
    budget = int(vmem_cap * 0.75)              # headroom for internal scratch

    w_bytes = I * H * 2                        # bf16, single pipeline buffer
    x_isz = jnp.dtype(hidden_states.dtype).itemsize
    r_isz = jnp.dtype(input_tensor.dtype).itemsize
    o_isz = jnp.dtype(out_dtype).itemsize
    per_row = 2 * (I * x_isz + H * r_isz + H * o_isz)   # double-buffered tiles
    rows_cap = max(8, (budget - w_bytes) // per_row)

    if block_m is None:
        block_m = _pick_block_m(M, min(512, rows_cap))
    grid = (M // block_m,)

    need = w_bytes + block_m * per_row + (2 << 20)      # small vec params + slack
    vmem_limit = int(min(vmem_cap, max(need, 32 * 1024 * 1024)))

    # -------- specs ---------------------------------------------------------- #
    x_spec = pl.BlockSpec((block_m, I), lambda i: (i, 0))
    r_spec = pl.BlockSpec((block_m, H), lambda i: (i, 0))
    # Resident weight: constant index map + single buffer (no double-buffering
    # for an operand that never changes across the grid).
    w_spec = pl.BlockSpec((I, H), lambda i: (0, 0), pipeline_mode=pl.Buffered(1))
    vec_spec = pl.BlockSpec((1, H), lambda i: (0, 0))
    o_spec = pl.BlockSpec((block_m, H), lambda i: (i, 0))

    kwargs = {}
    if alias_residual:
        # Residual tile is fully consumed before the output tile is written, so
        # aliasing input_tensor with the output is safe (saves one HBM buffer).
        kwargs["input_output_aliases"] = {1: 0}

    out = pl.pallas_call(
        functools.partial(bert_output_kernel, eps=eps, inv_h=1.0 / H),
        grid=grid,
        in_specs=[x_spec, r_spec, w_spec, vec_spec, vec_spec, vec_spec],
        out_specs=o_spec,
        out_shape=jax.ShapeDtypeStruct((M, H), out_dtype),
        compiler_params=pltpu.CompilerParams(
            dimension_semantics=("parallel",),
            vmem_limit_bytes=vmem_limit),
        **kwargs,
    )(x2, r2, w, b, gamma, beta)
    return out.reshape(B, S, H)


# ----------------------------- reference ----------------------------------- #

def bert_output_ref(hidden_states, input_tensor, params, eps=1e-12):
    h = hidden_states @ params["w"] + params["b"]
    h = h + input_tensor
    mean = jnp.mean(h, axis=-1, keepdims=True)
    var = jnp.mean((h - mean) ** 2, axis=-1, keepdims=True)
    return (h - mean) / jnp.sqrt(var + eps) * params["gamma"] + params["beta"]


# ------------------------------- main --------------------------------------- #

if __name__ == "__main__":
    # toy config: hidden_size=32, intermediate_size=128 (=4*H), seq=8, batch=2
    # (production shapes H=768/1024, I=3072/4096, S=512 use the same code path;
    #  the lane-dense / MXU-width claims only fully hold when H % 128 == 0.)
    B, S, H = 2, 8, 32
    I = 4 * H

    key = jax.random.PRNGKey(0)
    k0, k1, k2, k3, k4, k5 = jax.random.split(key, 6)

    hidden_states = jax.random.normal(k0, (B, S, I), dtype=jnp.float32)
    input_tensor = jax.random.normal(k1, (B, S, H), dtype=jnp.float32)

    params = {
        "w": jax.random.normal(k2, (I, H), dtype=jnp.float32) * 0.05,
        "b": jax.random.normal(k3, (H,), dtype=jnp.float32) * 0.05,
        "gamma": 1.0 + jax.random.normal(k4, (H,), dtype=jnp.float32) * 0.05,
        "beta": jax.random.normal(k5, (H,), dtype=jnp.float32) * 0.05,
    }

    out_ref = bert_output_ref(hidden_states, input_tensor, params, eps=1e-12)

    out = bert_output(hidden_states, input_tensor, params, eps=1e-12)
    jax.block_until_ready(out)

    assert out.shape == (B, S, H)
    # bf16 MXU feed (f32 accumulation + f32 LayerNorm) -> loosened tolerance
    # vs the pure-f32 reference.
    max_err = float(jnp.max(jnp.abs(out - out_ref)))
    assert jnp.allclose(out, out_ref, atol=2e-2, rtol=2e-2), max_err

    print("KERNEL_OK")
</pallas_src>

<mosaic_0001>
module attributes {stable_mosaic.version = 11 : i64} {
  func.func @bert_output_kernel(%arg0: i32, %arg1: memref<16x128xf32, #tpu.memory_space<vmem>>, %arg2: memref<16x32xf32, #tpu.memory_space<vmem>>, %arg3: memref<128x32xbf16, #tpu.memory_space<vmem>>, %arg4: memref<1x32xf32, #tpu.memory_space<vmem>>, %arg5: memref<1x32xf32, #tpu.memory_space<vmem>>, %arg6: memref<1x32xf32, #tpu.memory_space<vmem>>, %arg7: memref<16x32xf32, #tpu.memory_space<vmem>>) attributes {dimension_semantics = [#tpu.dimension_semantics<parallel>], iteration_bounds = array<i64: 1>, scalar_prefetch = 0 : i64, scratch_operands = 0 : i64, tpu.core_type = #tpu.core_type<tc>, window_params = [{transform_indices = @transform_0, window_bounds = array<i64: 16, 128>}, {transform_indices = @transform_1, window_bounds = array<i64: 16, 32>}, {pipeline_mode = #tpu.pipeline_mode<synchronous>, transform_indices = @transform_2, window_bounds = array<i64: 128, 32>}, {pipeline_mode = #tpu.pipeline_mode<synchronous>, transform_indices = @transform_3, window_bounds = array<i64: 1, 32>}, {pipeline_mode = #tpu.pipeline_mode<synchronous>, transform_indices = @transform_4, window_bounds = array<i64: 1, 32>}, {pipeline_mode = #tpu.pipeline_mode<synchronous>, transform_indices = @transform_5, window_bounds = array<i64: 1, 32>}, {transform_indices = @transform_6, window_bounds = array<i64: 16, 32>}]} {
    %c0 = arith.constant 0 : index
    %c0_0 = arith.constant 0 : index
    %0 = vector.load %arg1[%c0, %c0_0] : memref<16x128xf32, #tpu.memory_space<vmem>>, vector<16x128xf32>
    %1 = arith.truncf %0 : vector<16x128xf32> to vector<16x128xbf16>
    %c0_1 = arith.constant 0 : index
    %c0_2 = arith.constant 0 : index
    %2 = vector.load %arg3[%c0_1, %c0_2] : memref<128x32xbf16, #tpu.memory_space<vmem>>, vector<128x32xbf16>
    %cst = arith.constant dense<0.000000e+00> : vector<16x32xf32>
    %3 = tpu.matmul %1, %2, %cst {dimension_numbers = #tpu.dot_dimension_numbers<[1], [0], [0], [1], [0, 0, 1, 1], [], []>} : vector<16x128xbf16>, vector<128x32xbf16>, vector<16x32xf32> -> vector<16x32xf32>
    %c0_3 = arith.constant 0 : index
    %c0_4 = arith.constant 0 : index
    %4 = vector.load %arg4[%c0_3, %c0_4] : memref<1x32xf32, #tpu.memory_space<vmem>>, vector<1x32xf32>
    %5 = vector.broadcast %4 : vector<1x32xf32> to vector<16x32xf32>
    %6 = arith.addf %3, %5 : vector<16x32xf32>
    %c0_5 = arith.constant 0 : index
    %c0_6 = arith.constant 0 : index
    %7 = vector.load %arg2[%c0_5, %c0_6] : memref<16x32xf32, #tpu.memory_space<vmem>>, vector<16x32xf32>
    %8 = arith.addf %6, %7 : vector<16x32xf32>
    %cst_7 = arith.constant dense<0.000000e+00> : vector<16xf32>
    %9 = vector.multi_reduction <add>, %8, %cst_7 [1] : vector<16x32xf32> to vector<16xf32>
    %10 = vector.shape_cast %9 : vector<16xf32> to vector<16x1xf32>
    %cst_8 = arith.constant 3.125000e-02 : f32
    %11 = vector.broadcast %cst_8 : f32 to vector<16x1xf32>
    %12 = arith.mulf %10, %11 : vector<16x1xf32>
    %13 = arith.mulf %8, %8 : vector<16x32xf32>
    %cst_9 = arith.constant dense<0.000000e+00> : vector<16xf32>
    %14 = vector.multi_reduction <add>, %13, %cst_9 [1] : vector<16x32xf32> to vector<16xf32>
    %15 = vector.shape_cast %14 : vector<16xf32> to vector<16x1xf32>
    %cst_10 = arith.constant 3.125000e-02 : f32
    %16 = vector.broadcast %cst_10 : f32 to vector<16x1xf32>
    %17 = arith.mulf %15, %16 : vector<16x1xf32>
    %18 = arith.mulf %12, %12 : vector<16x1xf32>
    %19 = arith.subf %17, %18 : vector<16x1xf32>
    %cst_11 = arith.constant 0.000000e+00 : f32
    %20 = vector.broadcast %cst_11 : f32 to vector<16x1xf32>
    %21 = arith.maximumf %19, %20 : vector<16x1xf32>
    %cst_12 = arith.constant 9.99999996E-13 : f32
    %22 = vector.broadcast %cst_12 : f32 to vector<16x1xf32>
    %23 = arith.addf %21, %22 : vector<16x1xf32>
    %24 = math.rsqrt %23 : vector<16x1xf32>
    %25 = vector.broadcast %12 : vector<16x1xf32> to vector<16x32xf32>
    %26 = arith.subf %8, %25 : vector<16x32xf32>
    %27 = vector.broadcast %24 : vector<16x1xf32> to vector<16x32xf32>
    %28 = arith.mulf %26, %27 : vector<16x32xf32>
    %c0_13 = arith.constant 0 : index
    %c0_14 = arith.constant 0 : index
    %29 = vector.load %arg5[%c0_13, %c0_14] : memref<1x32xf32, #tpu.memory_space<vmem>>, vector<1x32xf32>
    %30 = vector.broadcast %29 : vector<1x32xf32> to vector<16x32xf32>
    %31 = arith.mulf %28, %30 : vector<16x32xf32>
    %c0_15 = arith.constant 0 : index
    %c0_16 = arith.constant 0 : index
    %32 = vector.load %arg6[%c0_15, %c0_16] : memref<1x32xf32, #tpu.memory_space<vmem>>, vector<1x32xf32>
    %33 = vector.broadcast %32 : vector<1x32xf32> to vector<16x32xf32>
    %34 = arith.addf %31, %33 : vector<16x32xf32>
    %c0_17 = arith.constant 0 : index
    %c0_18 = arith.constant 0 : index
    %35 = vector.load %arg7[%c0_17, %c0_18] : memref<16x32xf32, #tpu.memory_space<vmem>>, vector<16x32xf32>
    tpu.vector_store %arg7[%c0_17, %c0_18], %34 {strides = array<i32>} : memref<16x32xf32, #tpu.memory_space<vmem>>, vector<16x32xf32>,
    return
  }
  func.func @transform_0(%arg0: i32) -> (i32, i32) {
    %c0_i32 = arith.constant 0 : i32
    %c0_i32_0 = arith.constant 0 : i32
    return %arg0, %c0_i32 : i32, i32
  }
  func.func @transform_1(%arg0: i32) -> (i32, i32) {
    %c0_i32 = arith.constant 0 : i32
    %c0_i32_0 = arith.constant 0 : i32
    return %arg0, %c0_i32 : i32, i32
  }
  func.func @transform_2(%arg0: i32) -> (i32, i32) {
    %c0_i32 = arith.constant 0 : i32
    %c0_i32_0 = arith.constant 0 : i32
    %c0_i32_1 = arith.constant 0 : i32
    return %c0_i32, %c0_i32_0 : i32, i32
  }
  func.func @transform_3(%arg0: i32) -> (i32, i32) {
    %c0_i32 = arith.constant 0 : i32
    %c0_i32_0 = arith.constant 0 : i32
    %c0_i32_1 = arith.constant 0 : i32
    return %c0_i32, %c0_i32_0 : i32, i32
  }
  func.func @transform_4(%arg0: i32) -> (i32, i32) {
    %c0_i32 = arith.constant 0 : i32
    %c0_i32_0 = arith.constant 0 : i32
    %c0_i32_1 = arith.constant 0 : i32
    return %c0_i32, %c0_i32_0 : i32, i32
  }
  func.func @transform_5(%arg0: i32) -> (i32, i32) {
    %c0_i32 = arith.constant 0 : i32
    %c0_i32_0 = arith.constant 0 : i32
    %c0_i32_1 = arith.constant 0 : i32
    return %c0_i32, %c0_i32_0 : i32, i32
  }
  func.func @transform_6(%arg0: i32) -> (i32, i32) {
    %c0_i32 = arith.constant 0 : i32
    %c0_i32_0 = arith.constant 0 : i32
    return %arg0, %c0_i32 : i32, i32
  }
}

</mosaic_0001>

<bundles_post_ra>
// kernel: tpu_custom_call.1
= control target key start
LH: loop header
LB: loop body
LE: loop exit
PB: predicated region body
PF: predicated region fallthrough
CT: control target
= control target key end

     0   :  { %v292_v1 = vmov 0.0   ;;  %vm293_vm0 = vmmov 0   ;;  %s386_s0 = inlined_call_operand.vmem [shape: f32[16,128], index: 0, kind: input, shape index: {}]   ;;  %s387_s1 = inlined_call_operand.vmem [shape: f32[16,32], index: 1, kind: input, shape index: {}]   ;;  %s388_s2 = inlined_call_operand.vmem [shape: bf16[128,32], index: 2, kind: input, shape index: {}]   ;;  %s389_s3 = inlined_call_operand.vmem [shape: f32[1,32], index: 3, kind: input, shape index: {}]   ;;  %s390_s4 = inlined_call_operand.vmem [shape: f32[1,32], index: 4, kind: input, shape index: {}]   ;;  %s391_s5 = inlined_call_operand.vmem [shape: f32[1,32], index: 5, kind: input, shape index: {}]   ;;  %s392_s6 = inlined_call_operand.hbm [shape: f32[16,32], index: 6, kind: output, shape index: {}]  }
   0x1   :  { %v258_v0 = vld [vmem:[%s388_s2 + $0x38] sm:$0xff]   ;;  %233 = vmatprep.subr.bf16.mxu0 %v292_v1  ;;  %v259_v2 = vld [vmem:[%s388_s2 + $0x30] sm:$0xff]   ;;  %249 = vmatprep.mubr.msk.bf16.mxu0 %vm293_vm0, %v292_v1  ;;  %v260_v3 = vld [vmem:[%s388_s2 + $0x28] sm:$0xff]  }
   0x2   :  { %234 = vmatpush3.bf16.msra.mxu0 %v258_v0 }
   0x3   :  { %235 = vmatprep.subr.bf16.mxu0 %v292_v1 }
   0x6   :  { %236 = vmatpush3.bf16.msra.mxu0 %v259_v2 }
   0x7   :  { %237 = vmatprep.subr.bf16.mxu0 %v292_v1 }
   0x8   :  { %11 = vsyncpa [#allocation3], 0  ;;  %v261_v4 = vld [vmem:[%s388_s2 + $0x20] sm:$0xff]   ;;  %v262_v5 = vld [vmem:[%s388_s2 + $0x18] sm:$0xff]   ;;  %vm144_vm1 = vcmask 261120   ;;  %s294_s23 = smov [#allocation2]  }
   0x9   :  { %v263_v6 = vld [vmem:[%s388_s2 + $0x10] sm:$0xff]   ;;  %v264_v7 = vld [vmem:[%s388_s2 + $0x8] sm:$0xff]   ;;  %v265_v8 = vld [vmem:[%s388_s2] sm:$0xff]   ;;  %s202_s24 = sshll.u32 %s294_s23, 4  ;;  %s203_s24 = int_to_ptr.vmem [resolvable:$true] %s202_s24 }
   0xa   :  { %238 = vmatpush3.bf16.msra.mxu0 %v260_v3  ;;  %v25_v9 = vld [vmem:[%s386_s0] sm:$0xff]  ;;  %v26_v10 = vld [vmem:[%s386_s0 + $0x8] sm:$0xff]  ;;  %p275_p1 = scmp.lt.s32.totalorder %s203_s24, %s203_s24 }
   0xb   :  { %239 = vmatprep.subr.bf16.mxu0 %v292_v1  ;;  %v27_v11 = vpack.c.bf16 %v26_v10, %v25_v9  ;;  %v213_v12 = vld [vmem:[%s389_s3] ss:$0 sm:$0xff]  ;;  %v141_v19 = vld [vmem:[%s387_s1 + $0x8] sm:$0xff] }
   0xc   :  { %v140_v14 = vld [vmem:[%s387_s1] sm:$0xff] }
   0xd   :  { %v222_v47 = vld [vmem:[%s390_s4] ss:$0 sm:$0xff]  ;;  %s270_s4 = scalar_lea.vmem %s203_s24, 256 }
   0xe   :  { %240 = vmatpush3.bf16.msra.mxu0 %v261_v4  ;;  %v223_v49 = vld [vmem:[%s391_s5] ss:$0 sm:$0xff]  ;;  %p271_p0 = scmp.ne.s32.totalorder %s203_s24, %s270_s4  ;;  %p276_p2 = scmp.lt.s32.totalorder %s270_s4, %s270_s4 }
   0xf   :  { %241 = vmatprep.subr.bf16.mxu0 %v292_v1 }
  0x10   :  { %p277_p3 = por %p276_p2, %p275_p1 }
  0x12   :  { %242 = vmatpush3.bf16.msra.mxu0 %v262_v5  ;;  %p278_p4 = pnand %p277_p3, %p271_p0 }
  0x13   :  { %243 = vmatprep.subr.bf16.mxu0 %v292_v1 }
  0x16   :  { %244 = vmatpush3.bf16.msra.mxu0 %v263_v6 }
  0x17   :  { %245 = vmatprep.subr.bf16.mxu0 %v292_v1 }
  0x1a   :  { %246 = vmatpush3.bf16.msra.mxu0 %v264_v7 }
  0x1b   :  { %247 = vmatprep.subr.bf16.mxu0 %v292_v1 }
  0x1e   :  { %248 = vmatpush3.bf16.msra.mxu0 %v265_v8 }
  0x21   :  { %250 = vmatmul.mubr.bf16.vlgmr.msra.gmra.mxu0 %v27_v11 }
  0xe1   :  { %v133_v13 = vpop.f32.mrf.mxu0 }
  0xe2   :  { %v134_v15 = vadd.f32 %v213_v12, %v133_v13 }
  0xe3   :  { %v251_v16 = vpop.f32.mrf.mxu0 }
  0xe4   :  { %v142_v17 = vadd.f32 %v140_v14, %v134_v15 }
  0xe5   :  { %v136_v18 = vpop.f32.mrf.mxu0 }
  0xe6   :  { %v137_v20 = vadd.f32 %v213_v12, %v136_v18  ;;  %v145_v21 = vsel %vm144_vm1, %v142_v17, 0.0  ;;  %v153_v22 = vmul.f32 %v142_v17, %v142_v17 }
  0xe7   :  { %146 = vadd.xlane.f32.xlu0 %v145_v21  ;;  %v252_v23 = vpop.f32.mrf.mxu0 }
  0xe8   :  { %v143_v24 = vadd.f32 %v141_v19, %v137_v20  ;;  %v155_v25 = vsel %vm144_vm1, %v153_v22, 0.0 }
  0xe9   :  { %156 = vadd.xlane.f32.xlu1 %v155_v25 }
  0xea   :  { %v148_v26 = vsel %vm144_vm1, %v143_v24, 0.0  ;;  %v154_v27 = vmul.f32 %v143_v24, %v143_v24 }
  0xeb   :  { %149 = vadd.xlane.f32.xlu0 %v148_v26 }
  0xec   :  { %v158_v28 = vsel %vm144_vm1, %v154_v27, 0.0 }
  0xed   :  { %159 = vadd.xlane.f32.xlu1 %v158_v28 }
 0x170   :  { %v147_v29 = vpop.xlane.xlu0 %146 }
 0x171   :  { %v151_v30 = vmul.f32 0.03125, %v147_v29 }
 0x172   :  { %v157_v31 = vpop.xlane.xlu1 %156 }
 0x173   :  { %v163_v32 = vmul.f32 %v151_v30, %v151_v30  ;;  %v161_v33 = vmul.f32 0.03125, %v157_v31  ;;  %v173_v45 = vsub.f32 %v142_v17, %v151_v30 }
 0x174   :  { %v150_v34 = vpop.xlane.xlu0 %149 }
 0x175   :  { %v165_v35 = vsub.f32 %v161_v33, %v163_v32  ;;  %v152_v36 = vmul.f32 0.03125, %v150_v34 }
 0x176   :  { %v160_v37 = vpop.xlane.xlu1 %159 }
 0x177   :  { %v167_v38 = vmax.f32 %v165_v35, 0.0  ;;  %v164_v39 = vmul.f32 %v152_v36, %v152_v36  ;;  %v162_v40 = vmul.f32 0.03125, %v160_v37  ;;  %v174_v50 = vsub.f32 %v143_v24, %v152_v36 }
 0x179   :  { %v169_v41 = vadd.f32 1e-12, %v167_v38  ;;  %v166_v42 = vsub.f32 %v162_v40, %v164_v39 }
 0x17b   :  { %266 = vrsqrt.f32 %v169_v41  ;;  %v168_v43 = vmax.f32 %v166_v42, 0.0 }
 0x17d   :  { %v170_v44 = vadd.f32 1e-12, %v168_v43 }
 0x17f   :  { %268 = vrsqrt.f32 %v170_v44 }
 0x188   :  { %v267_v46 = vpop.eup %266 }
 0x189   :  { %v175_v48 = vmul.f32 %v267_v46, %v173_v45 }
 0x18b   :  { %v184_v51 = vmul.f32 %v222_v47, %v175_v48 }
 0x18c   :  { %v269_v52 = vpop.eup %268 }
 0x18d   :  { %v176_v53 = vmul.f32 %v269_v52, %v174_v50  ;;  %v193_v54 = vadd.f32 %v223_v49, %v184_v51 }
 0x18f   :  { %v185_v55 = vmul.f32 %v222_v47, %v176_v53  ;;  %195 = vst.msk [vmem:[#allocation2] sm:$0xff] %vm144_vm1, %v193_v54 }
 0x191   :  { %v194_v56 = vadd.f32 %v223_v49, %v185_v55 }
 0x193   :  { %196 = vst.msk [vmem:[#allocation2 + $0x8] sm:$0xff] %vm144_vm1, %v194_v56 }
 0x194   :  { %281 = shalt.err (!%p278_p4)
}
 0x195   :  { %s295_s5 = smov 128   ;;  %s296_s25 = smov 8  }
 0x196   :  { %208 = dma.vmem_to_hbm [thread:$0]  %s203_s24, 256, %s392_s6, [#allocation3], %s295_s5, %s295_s5, %s296_s25  }
 0x197   :  { %290 = dma.done.wait [#allocation3], 256  }
 0x198   :  { %291 = vsyncadd [#allocation3], 4294967040 }
 0x199   :  { %212 = vsyncpa [#allocation3], 1 }

</bundles_post_ra>
